<compile_context>
chip_gen: v6e
topology: v6e:2x2x1
jax: 0.10.0
libtpu: 0.0.40
codegen_flags: <defaults>
</compile_context>

<pallas_src>
import functools

import jax
import jax.numpy as jnp
from jax.experimental import pallas as pl
from jax.experimental.pallas import tpu as pltpu


def _round_up(x, m):
    return ((x + m - 1) // m) * m


def linear_kernel(x_ref, w_ref, b_ref, o_ref, acc_ref):
    k = pl.program_id(2)

    @pl.when(k == 0)
    def _init():
        acc_ref[...] = jnp.zeros_like(acc_ref)

    # (tm, tk) @ (tk, tn) on the MXU, f32 accumulate.
    acc_ref[...] += jnp.dot(
        x_ref[...], w_ref[...], preferred_element_type=jnp.float32
    )

    @pl.when(k == pl.num_programs(2) - 1)
    def _finalize():
        o_ref[...] = (
            acc_ref[...] + b_ref[...].astype(jnp.float32)
        ).astype(o_ref.dtype)


@functools.partial(jax.jit, static_argnames=("tm", "tn", "tk"))
def linear_layer(x, weight, bias=None, *, tm=128, tn=128, tk=256):
    """Pallas equivalent of torch.nn.Linear forward.

    x:      (B, input_dim)
    weight: (output_dim, input_dim)   -- torch layout
    bias:   (output_dim,) or None
    returns (B, output_dim)
    """
    B, D_in = x.shape
    D_out, _ = weight.shape

    if bias is None:
        bias = jnp.zeros((D_out,), dtype=x.dtype)

    # Clamp tiles to the (aligned) problem size, keeping (8, 128) divisibility.
    tm = min(tm, _round_up(B, 8))
    tn = min(tn, _round_up(D_out, 128))
    tk = min(tk, _round_up(D_in, 128))

    Mp = _round_up(B, tm)
    Np = _round_up(D_out, tn)
    Kp = _round_up(D_in, tk)

    # One-time HBM-side layout prep: pad + pre-transpose weight to (K, N) so
    # the MXU consumes it with the contraction dim on sublanes (no vxpose).
    x_p = jnp.pad(x, ((0, Mp - B), (0, Kp - D_in)))
    w_p = jnp.pad(weight.T, ((0, Kp - D_in), (0, Np - D_out)))
    b_p = jnp.pad(bias.reshape(1, D_out), ((0, 0), (0, Np - D_out)))

    grid = (Mp // tm, Np // tn, Kp // tk)

    itemsize = jnp.dtype(x.dtype).itemsize
    cost = pl.CostEstimate(
        flops=2 * Mp * Kp * Np,
        transcendentals=0,
        bytes_accessed=(Mp * Kp + Kp * Np + Np + Mp * Np) * itemsize,
    )

    out_p = pl.pallas_call(
        linear_kernel,
        out_shape=jax.ShapeDtypeStruct((Mp, Np), x.dtype),
        grid_spec=pltpu.PrefetchScalarGridSpec(
            num_scalar_prefetch=0,
            grid=grid,
            in_specs=[
                pl.BlockSpec((tm, tk), lambda i, j, k: (i, k)),   # x tile
                pl.BlockSpec((tk, tn), lambda i, j, k: (k, j)),   # W^T tile
                pl.BlockSpec((1, tn), lambda i, j, k: (0, j)),    # bias tile
            ],
            out_specs=pl.BlockSpec((tm, tn), lambda i, j, k: (i, j)),
            scratch_shapes=[pltpu.VMEM((tm, tn), jnp.float32)],
        ),
        compiler_params=pltpu.CompilerParams(
            dimension_semantics=("parallel", "parallel", "arbitrary"),
        ),
        cost_estimate=cost,
    )(x_p, w_p, b_p)

    return out_p[:B, :D_out]


if __name__ == "__main__":
    batch = 8
    input_dim = 32
    output_dim = 16

    key = jax.random.PRNGKey(0)
    kx, kw, kb = jax.random.split(key, 3)

    x = jax.random.normal(kx, (batch, input_dim), dtype=jnp.float32)
    # Deterministic "Kaiming-uniform-ish" init matching nn.Linear param shapes.
    bound = 1.0 / (input_dim ** 0.5)
    weight = jax.random.uniform(
        kw, (output_dim, input_dim), minval=-bound, maxval=bound,
        dtype=jnp.float32)
    bias = jax.random.uniform(
        kb, (output_dim,), minval=-bound, maxval=bound, dtype=jnp.float32)

    out = linear_layer(x, weight, bias)
    jax.block_until_ready(out)

    # Reference check against plain JAX.
    ref = x @ weight.T + bias
    assert out.shape == (batch, output_dim)
    assert jnp.allclose(out, ref, atol=1e-5, rtol=1e-5)

    print("KERNEL_OK")
</pallas_src>

<mosaic_0001>
module attributes {stable_mosaic.version = 11 : i64} {
  func.func @linear_kernel(%arg0: i32, %arg1: i32, %arg2: i32, %arg3: memref<8x128xf32, #tpu.memory_space<vmem>>, %arg4: memref<128x128xf32, #tpu.memory_space<vmem>>, %arg5: memref<1x128xf32, #tpu.memory_space<vmem>>, %arg6: memref<8x128xf32, #tpu.memory_space<vmem>>, %arg7: memref<8x128xf32, #tpu.memory_space<vmem>>) attributes {dimension_semantics = [#tpu.dimension_semantics<parallel>, #tpu.dimension_semantics<parallel>, #tpu.dimension_semantics<arbitrary>], iteration_bounds = array<i64: 1, 1, 1>, scalar_prefetch = 0 : i64, scratch_operands = 1 : i64, tpu.core_type = #tpu.core_type<tc>, window_params = [{transform_indices = @transform_0, window_bounds = array<i64: 8, 128>}, {transform_indices = @transform_1, window_bounds = array<i64: 128, 128>}, {transform_indices = @transform_2, window_bounds = array<i64: 1, 128>}, {transform_indices = @transform_3, window_bounds = array<i64: 8, 128>}]} {
    %c0_i32 = arith.constant 0 : i32
    %0 = arith.cmpi eq, %arg2, %c0_i32 : i32
    %1 = arith.extui %0 : i1 to i32
    %c0_i32_0 = arith.constant 0 : i32
    %2 = arith.cmpi ne, %1, %c0_i32_0 : i32
    scf.if %2 {
      %cst_10 = arith.constant 0.000000e+00 : f32
      %12 = vector.broadcast %cst_10 : f32 to vector<8x128xf32>
      %c0_11 = arith.constant 0 : index
      %c0_12 = arith.constant 0 : index
      %13 = vector.load %arg7[%c0_11, %c0_12] : memref<8x128xf32, #tpu.memory_space<vmem>>, vector<8x128xf32>
      tpu.vector_store %arg7[%c0_11, %c0_12], %12 {strides = array<i32>} : memref<8x128xf32, #tpu.memory_space<vmem>>, vector<8x128xf32>,
    } else {
    }
    %c0 = arith.constant 0 : index
    %c0_1 = arith.constant 0 : index
    %3 = vector.load %arg7[%c0, %c0_1] : memref<8x128xf32, #tpu.memory_space<vmem>>, vector<8x128xf32>
    %c0_2 = arith.constant 0 : index
    %c0_3 = arith.constant 0 : index
    %4 = vector.load %arg3[%c0_2, %c0_3] : memref<8x128xf32, #tpu.memory_space<vmem>>, vector<8x128xf32>
    %c0_4 = arith.constant 0 : index
    %c0_5 = arith.constant 0 : index
    %5 = vector.load %arg4[%c0_4, %c0_5] : memref<128x128xf32, #tpu.memory_space<vmem>>, vector<128x128xf32>
    %cst = arith.constant dense<0.000000e+00> : vector<8x128xf32>
    %6 = tpu.matmul %4, %5, %cst {dimension_numbers = #tpu.dot_dimension_numbers<[1], [0], [0], [1], [0, 0, 1, 1], [], []>} : vector<8x128xf32>, vector<128x128xf32>, vector<8x128xf32> -> vector<8x128xf32>
    %7 = arith.addf %3, %6 : vector<8x128xf32>
    %c0_6 = arith.constant 0 : index
    %c0_7 = arith.constant 0 : index
    %8 = vector.load %arg7[%c0_6, %c0_7] : memref<8x128xf32, #tpu.memory_space<vmem>>, vector<8x128xf32>
    tpu.vector_store %arg7[%c0_6, %c0_7], %7 {strides = array<i32>} : memref<8x128xf32, #tpu.memory_space<vmem>>, vector<8x128xf32>,
    %c0_i32_8 = arith.constant 0 : i32
    %9 = arith.cmpi eq, %arg2, %c0_i32_8 : i32
    %10 = arith.extui %9 : i1 to i32
    %c0_i32_9 = arith.constant 0 : i32
    %11 = arith.cmpi ne, %10, %c0_i32_9 : i32
    scf.if %11 {
      %c0_10 = arith.constant 0 : index
      %c0_11 = arith.constant 0 : index
      %12 = vector.load %arg7[%c0_10, %c0_11] : memref<8x128xf32, #tpu.memory_space<vmem>>, vector<8x128xf32>
      %c0_12 = arith.constant 0 : index
      %c0_13 = arith.constant 0 : index
      %13 = vector.load %arg5[%c0_12, %c0_13] : memref<1x128xf32, #tpu.memory_space<vmem>>, vector<1x128xf32>
      %14 = vector.broadcast %13 : vector<1x128xf32> to vector<8x128xf32>
      %15 = arith.addf %12, %14 : vector<8x128xf32>
      %c0_14 = arith.constant 0 : index
      %c0_15 = arith.constant 0 : index
      %16 = vector.load %arg6[%c0_14, %c0_15] : memref<8x128xf32, #tpu.memory_space<vmem>>, vector<8x128xf32>
      tpu.vector_store %arg6[%c0_14, %c0_15], %15 {strides = array<i32>} : memref<8x128xf32, #tpu.memory_space<vmem>>, vector<8x128xf32>,
    } else {
    }
    return
  }
  func.func @transform_0(%arg0: i32, %arg1: i32, %arg2: i32) -> (i32, i32) {
    %c0_i32 = arith.constant 0 : i32
    return %arg0, %arg2 : i32, i32
  }
  func.func @transform_1(%arg0: i32, %arg1: i32, %arg2: i32) -> (i32, i32) {
    %c0_i32 = arith.constant 0 : i32
    return %arg2, %arg1 : i32, i32
  }
  func.func @transform_2(%arg0: i32, %arg1: i32, %arg2: i32) -> (i32, i32) {
    %c0_i32 = arith.constant 0 : i32
    %c0_i32_0 = arith.constant 0 : i32
    return %c0_i32, %arg1 : i32, i32
  }
  func.func @transform_3(%arg0: i32, %arg1: i32, %arg2: i32) -> (i32, i32) {
    %c0_i32 = arith.constant 0 : i32
    return %arg0, %arg1 : i32, i32
  }
}

</mosaic_0001>

<bundles_post_ra>
// kernel: linear_layer.1
= control target key start
LH: loop header
LB: loop body
LE: loop exit
PB: predicated region body
PF: predicated region fallthrough
CT: control target
= control target key end

     0   :  { %v215_v1 = vmov 0.0   ;;  %vm216_vm0 = vmmov 0   ;;  %s295_s0 = inlined_call_operand.vmem [shape: f32[8,128], index: 0, kind: input, shape index: {}]   ;;  %s296_s1 = inlined_call_operand.vmem [shape: f32[128,128], index: 1, kind: input, shape index: {}]   ;;  %s297_s2 = inlined_call_operand.vmem [shape: f32[1,128], index: 2, kind: input, shape index: {}]   ;;  %s298_s3 = inlined_call_operand.hbm [shape: f32[8,128], index: 3, kind: output, shape index: {}]  }
   0x1   :  { %v37_v0 = vld [vmem:[%s296_s1 + $0x78] sm:$0xff]  ;;  %155 = vmatprep.subr.mxu0 %v215_v1  ;;  %v36_v2 = vld [vmem:[%s296_s1 + $0x70] sm:$0xff]  ;;  %187 = vmatprep.mubr.msk.f32.mxu0 %vm216_vm0, %v215_v1  ;;  %v35_v3 = vld [vmem:[%s296_s1 + $0x68] sm:$0xff] }
   0x2   :  { %156 = vmatpush3.msra.mxu0 %v37_v0  ;;  %v34_v4 = vld [vmem:[%s296_s1 + $0x60] sm:$0xff] }
   0x3   :  { %157 = vmatprep.subr.mxu0 %v215_v1 }
   0x4   :  { %158 = vmatpush3.msra.mxu0 %v36_v2 }
   0x5   :  { %159 = vmatprep.subr.mxu0 %v215_v1 }
   0x6   :  { %8 = vsyncpa [#allocation4], 0  ;;  %160 = vmatpush3.msra.mxu0 %v35_v3  ;;  %v33_v5 = vld [vmem:[%s296_s1 + $0x58] sm:$0xff]  ;;  %v32_v6 = vld [vmem:[%s296_s1 + $0x50] sm:$0xff]  ;;  %s217_s21 = smov [#allocation3]  }
   0x7   :  { %161 = vmatprep.subr.mxu0 %v215_v1  ;;  %v31_v7 = vld [vmem:[%s296_s1 + $0x48] sm:$0xff]  ;;  %v30_v8 = vld [vmem:[%s296_s1 + $0x40] sm:$0xff]  ;;  %v29_v9 = vld [vmem:[%s296_s1 + $0x38] sm:$0xff]  ;;  %s129_s22 = sshll.u32 %s217_s21, 4  ;;  %s130_s22 = int_to_ptr.vmem [resolvable:$true] %s129_s22 }
   0x8   :  { %162 = vmatpush3.msra.mxu0 %v34_v4  ;;  %v28_v10 = vld [vmem:[%s296_s1 + $0x30] sm:$0xff]  ;;  %v27_v11 = vld [vmem:[%s296_s1 + $0x28] sm:$0xff]  ;;  %v26_v12 = vld [vmem:[%s296_s1 + $0x20] sm:$0xff]  ;;  %p198_p1 = scmp.lt.s32.totalorder %s130_s22, %s130_s22 }
   0x9   :  { %163 = vmatprep.subr.mxu0 %v215_v1  ;;  %v25_v13 = vld [vmem:[%s296_s1 + $0x18] sm:$0xff]  ;;  %v24_v14 = vld [vmem:[%s296_s1 + $0x10] sm:$0xff]  ;;  %v23_v15 = vld [vmem:[%s296_s1 + $0x8] sm:$0xff] }
   0xa   :  { %164 = vmatpush3.msra.mxu0 %v33_v5  ;;  %v22_v16 = vld [vmem:[%s296_s1] sm:$0xff]  ;;  %s193_s1 = scalar_lea.vmem %s130_s22, 128 }
   0xb   :  { %165 = vmatprep.subr.mxu0 %v215_v1  ;;  %v21_v17 = vld [vmem:[%s295_s0] sm:$0xff]  ;;  %p194_p0 = scmp.ne.s32.totalorder %s130_s22, %s193_s1  ;;  %p199_p2 = scmp.lt.s32.totalorder %s193_s1, %s193_s1 }
   0xc   :  { %166 = vmatpush3.msra.mxu0 %v32_v6  ;;  %v137_v18 = vld [vmem:[%s297_s2] ss:$0 sm:$0xff] }
   0xd   :  { %167 = vmatprep.subr.mxu0 %v215_v1  ;;  %p200_p3 = por %p199_p2, %p198_p1 }
   0xe   :  { %168 = vmatpush3.msra.mxu0 %v31_v7 }
   0xf   :  { %169 = vmatprep.subr.mxu0 %v215_v1  ;;  %p201_p4 = pnand %p200_p3, %p194_p0 }
  0x10   :  { %170 = vmatpush3.msra.mxu0 %v30_v8 }
  0x11   :  { %171 = vmatprep.subr.mxu0 %v215_v1 }
  0x12   :  { %172 = vmatpush3.msra.mxu0 %v29_v9 }
  0x13   :  { %173 = vmatprep.subr.mxu0 %v215_v1 }
  0x14   :  { %174 = vmatpush3.msra.mxu0 %v28_v10 }
  0x15   :  { %175 = vmatprep.subr.mxu0 %v215_v1 }
  0x16   :  { %176 = vmatpush3.msra.mxu0 %v27_v11 }
  0x17   :  { %177 = vmatprep.subr.mxu0 %v215_v1 }
  0x18   :  { %178 = vmatpush3.msra.mxu0 %v26_v12 }
  0x19   :  { %179 = vmatprep.subr.mxu0 %v215_v1 }
  0x1a   :  { %180 = vmatpush3.msra.mxu0 %v25_v13 }
  0x1b   :  { %181 = vmatprep.subr.mxu0 %v215_v1 }
  0x1c   :  { %182 = vmatpush3.msra.mxu0 %v24_v14 }
  0x1d   :  { %183 = vmatprep.subr.mxu0 %v215_v1 }
  0x1e   :  { %184 = vmatpush3.msra.mxu0 %v23_v15 }
  0x1f   :  { %185 = vmatprep.subr.mxu0 %v215_v1 }
  0x20   :  { %186 = vmatpush3.msra.mxu0 %v22_v16 }
  0x21   :  { %188 = vmatmul.mubr.f32.vlgmr.msra.gmra.mxu0 %v21_v17 }
  0xe1   :  { %v104_v19 = vpop.f32.mrf.mxu0 }
  0xe2   :  { %v121_v20 = vadd.f32 %v137_v18, %v104_v19 }
  0xe3   :  { %v189_v21 = vpop.f32.mrf.mxu0 }
  0xe4   :  { %122 = vst [vmem:[#allocation3] sm:$0xff] %v121_v20 }
  0xe5   :  { %204 = shalt.err (!%p201_p4)
}
  0xe6   :  { %132 = dma.vmem_to_hbm [thread:$0]  %s130_s22, 128, %s298_s3, [#allocation4]  }
  0xe7   :  { %213 = dma.done.wait [#allocation4], 128  }
  0xe8   :  { %214 = vsyncadd [#allocation4], 4294967168 }
  0xe9   :  { %136 = vsyncpa [#allocation4], 1 }

</bundles_post_ra>
